<compile_context>
chip_gen: v7x
topology: tpu7x:2x2x1
jax: 0.10.0
libtpu: 0.0.40
codegen_flags: <defaults>
</compile_context>

<pallas_src>
import functools

import jax
import jax.numpy as jnp
from jax.experimental import pallas as pl
from jax.experimental.pallas import tpu as pltpu

WEIGHTBITS = 4
# coeff[0] = -2^(b-1)/(2^(b-1)-1), coeff[i>=1] = 2^(i-1)/(2^(b-1)-1)
_DEN = 2 ** (WEIGHTBITS - 1) - 1
COEFFS = tuple(
    [-(2 ** (WEIGHTBITS - 1)) / _DEN]
    + [2 ** (i - 1) / _DEN for i in range(1, WEIGHTBITS)]
)

_LANE = 128
_SUBLANE = 8
_MAX_FULL_K = 1024                 # K at/below this: single full-K block
_TK = 512                          # K tile when K is large (multiple of 256)
_TM_MAX = 1024                     # max M tile (amortizes per-step overhead)
_TN_MAX = 256                      # Cout tile (VMEM bound on v7x, 2nd-TC work)
_VMEM_BUDGET = 24 * 1024 * 1024    # conservative per-call tile budget
_VMEM_LIMIT = 48 * 1024 * 1024     # requested scoped VMEM (< v7x 64 MiB phys)


def _round_up(x, m):
    return ((x + m - 1) // m) * m


# ---------------------------------------------------------------------------
# Kernels
# ---------------------------------------------------------------------------
def _matmul_bias_kernel(p_ref, w_ref, b_ref, o_ref, acc_ref):
    """Grid (Mt, Nt, Kt): acc starts at bias, acc += p @ w; store on last K."""
    k_idx = pl.program_id(2)

    @pl.when(k_idx == 0)
    def _():
        acc_ref[...] = jnp.broadcast_to(b_ref[...], acc_ref.shape)

    acc_ref[...] += jnp.dot(p_ref[...], w_ref[...],
                            preferred_element_type=jnp.float32)

    @pl.when(k_idx == pl.num_programs(2) - 1)
    def _():
        o_ref[...] = acc_ref[...].astype(o_ref.dtype)


def _matmul_bias_single_k_kernel(p_ref, w_ref, b_ref, o_ref):
    """Grid (Mt, Nt), whole K per block: no accumulator scratch round-trip."""
    o_ref[...] = (jnp.dot(p_ref[...], w_ref[...],
                          preferred_element_type=jnp.float32)
                  + b_ref[...]).astype(o_ref.dtype)


# ---------------------------------------------------------------------------
# Host-side glue
# ---------------------------------------------------------------------------
def _im2col_nchw_bf16(x, kh, kw, stride, padding, dilation):
    """im2col with (Cin, kh, kw)-major flattening (matches weight.reshape).

    x is cast to bf16 BEFORE padding/gathering so the materialized patches
    array (largest intermediate, ~KH*KW x the input) is built in half the
    bytes -- no separate f32->bf16 pass over HBM afterwards.
    """
    # TODO(synk): fuse im2col into the Pallas kernel (keep x in HBM with
    # memory_space=pl.ANY, DMA the overlapping input rows per M-tile) to
    # eliminate the KH*KW HBM expansion of the materialized patches entirely.
    n, c, _, _ = x.shape
    xb = x.astype(jnp.bfloat16)
    xp = jnp.pad(xb, ((0, 0), (0, 0), (padding, padding), (padding, padding)))
    hp, wp = xp.shape[2], xp.shape[3]
    oh = (hp - dilation * (kh - 1) - 1) // stride + 1
    ow = (wp - dilation * (kw - 1) - 1) // stride + 1
    cols = []
    for i in range(kh):
        for j in range(kw):
            cols.append(
                xp[:, :,
                   i * dilation: i * dilation + stride * (oh - 1) + 1: stride,
                   j * dilation: j * dilation + stride * (ow - 1) + 1: stride]
            )                                              # each (N, C, OH, OW)
    patches = jnp.stack(cols, axis=2)                      # (N, C, KH*KW, OH, OW)
    patches = patches.reshape(n, c * kh * kw, oh, ow)
    patches = patches.transpose(0, 2, 3, 1).reshape(n * oh * ow, c * kh * kw)
    return patches, oh, ow


@functools.partial(
    jax.jit, static_argnames=("stride", "padding", "dilation", "out_dtype"))
def conv2d_split2binary(x, weights, biases, *, stride=1, padding=0, dilation=1,
                        out_dtype=jnp.float32):
    """x: (N, Cin, H, W); weights: (4, Cout, Cin, KH, KW); biases: (4, Cout)."""
    n, cin_x = x.shape[0], x.shape[1]
    nb, cout, cin, kh, kw = weights.shape
    assert nb == WEIGHTBITS
    # groups != 1 is not supported (module default groups=1); fail loudly.
    assert cin == cin_x, "groups != 1 (or Cin mismatch) is not supported"

    patches, oh, ow = _im2col_nchw_bf16(x, kh, kw, stride, padding, dilation)
    m, k = patches.shape
    out_itemsize = jnp.dtype(out_dtype).itemsize

    # --- Fold the 4 convolutions into one (exact: combination is linear). ----
    coeffs = jnp.asarray(COEFFS, dtype=jnp.float32)
    w_comb = jnp.tensordot(coeffs, weights.astype(jnp.float32), axes=1)  # (Cout,Cin,KH,KW)
    b_comb = jnp.tensordot(coeffs, biases.astype(jnp.float32), axes=1)   # (Cout,)

    # --- Cout (lane) tiling. --------------------------------------------------
    cout_pad = _round_up(cout, _LANE)
    if cout_pad > _TN_MAX:
        tn = _TN_MAX
        cout_pad = _round_up(cout_pad, tn)
    else:
        tn = cout_pad

    # --- K tiling. ------------------------------------------------------------
    if k <= _MAX_FULL_K:
        k_pad, tk = k, k
        single_k = True
    else:
        tk = _TK
        k_pad = _round_up(k, tk)
        single_k = False

    # --- M tiling: largest tile within the VMEM budget with least padding. ----
    def vmem_bytes(tm):
        b = (2 * tm * tk * 2                 # patches, bf16, double-buffered
             + 2 * tk * tn * 2               # W, bf16, double-buffered
             + 2 * tm * tn * out_itemsize    # output, double-buffered
             + 2 * tn * 4)                   # bias
        if not single_k:
            b += tm * tn * 4                 # f32 accumulator scratch
        return b

    m8 = _round_up(m, _SUBLANE)
    if m8 <= _TM_MAX and vmem_bytes(m8) <= _VMEM_BUDGET:
        tm, m_pad = m8, m8                   # single M tile, zero padding waste
    else:
        cands = [t for t in (1024, 512, 256, 128, 64, 32, 16, 8)
                 if vmem_bytes(t) <= _VMEM_BUDGET] or [8]
        tm = min(cands, key=lambda t: (_round_up(m, t), -t))
        m_pad = _round_up(m, tm)

    # --- Operand prep (bf16 matmul operands, f32 bias). ------------------------
    w_kc = w_comb.reshape(cout, k).T                                      # (K, Cout)
    w_bf = jnp.pad(w_kc, ((0, k_pad - k),
                          (0, cout_pad - cout))).astype(jnp.bfloat16)
    b_2d = jnp.pad(b_comb, (0, cout_pad - cout)).reshape(1, cout_pad)

    if m_pad != m or k_pad != k:
        patches = jnp.pad(patches, ((0, m_pad - m), (0, k_pad - k)))

    cost = pl.CostEstimate(
        flops=2 * m_pad * k_pad * cout_pad,
        transcendentals=0,
        bytes_accessed=(m_pad * k_pad * 2 + k_pad * cout_pad * 2
                        + cout_pad * 4 + m_pad * cout_pad * out_itemsize),
    )
    cparams = pltpu.CompilerParams(
        dimension_semantics=(("parallel", "parallel") if single_k
                             else ("parallel", "parallel", "arbitrary")),
        vmem_limit_bytes=_VMEM_LIMIT,
    )

    if single_k:
        grid = (m_pad // tm, cout_pad // tn)
        out_flat = pl.pallas_call(
            _matmul_bias_single_k_kernel,
            out_shape=jax.ShapeDtypeStruct((m_pad, cout_pad), out_dtype),
            grid_spec=pltpu.PrefetchScalarGridSpec(
                num_scalar_prefetch=0,
                grid=grid,
                in_specs=[
                    pl.BlockSpec((tm, tk), lambda i, j: (i, 0)),
                    pl.BlockSpec((tk, tn), lambda i, j: (0, j)),
                    pl.BlockSpec((1, tn), lambda i, j: (0, j)),
                ],
                out_specs=pl.BlockSpec((tm, tn), lambda i, j: (i, j)),
            ),
            compiler_params=cparams,
            cost_estimate=cost,
        )(patches, w_bf, b_2d)
    else:
        grid = (m_pad // tm, cout_pad // tn, k_pad // tk)
        out_flat = pl.pallas_call(
            _matmul_bias_kernel,
            out_shape=jax.ShapeDtypeStruct((m_pad, cout_pad), out_dtype),
            grid_spec=pltpu.PrefetchScalarGridSpec(
                num_scalar_prefetch=0,
                grid=grid,
                in_specs=[
                    pl.BlockSpec((tm, tk), lambda i, j, kk: (i, kk)),
                    pl.BlockSpec((tk, tn), lambda i, j, kk: (kk, j)),
                    pl.BlockSpec((1, tn), lambda i, j, kk: (0, j)),
                ],
                out_specs=pl.BlockSpec((tm, tn), lambda i, j, kk: (i, j)),
                scratch_shapes=[pltpu.VMEM((tm, tn), jnp.float32)],
            ),
            compiler_params=cparams,
            cost_estimate=cost,
        )(patches, w_bf, b_2d)

    out = out_flat[:m, :cout].reshape(n, oh, ow, cout).transpose(0, 3, 1, 2)
    return out


# ---------------------------------------------------------------------------
# Reference + test
# ---------------------------------------------------------------------------
def _reference(x, weights, biases, *, stride, padding, dilation):
    """Pure-JAX f32 reference mirroring the PyTorch forward."""
    dn = jax.lax.conv_dimension_numbers(x.shape, weights[0].shape,
                                        ("NCHW", "OIHW", "NCHW"))
    out = None
    for i, c in enumerate(COEFFS):
        yi = jax.lax.conv_general_dilated(
            x, weights[i], window_strides=(stride, stride),
            padding=[(padding, padding), (padding, padding)],
            rhs_dilation=(dilation, dilation), dimension_numbers=dn)
        yi = yi + biases[i].reshape(1, -1, 1, 1)
        out = c * yi if out is None else out + c * yi
    return out


if __name__ == "__main__":
    # Small shapes consistent with the module (conv on a CIFAR-like map).
    N, Cin, H, W = 2, 4, 16, 16
    Cout, KH, KW = 8, 3, 3
    stride, padding, dilation = 1, 1, 1

    key = jax.random.PRNGKey(0)
    kx, kw_, kb = jax.random.split(key, 3)
    x = jax.random.normal(kx, (N, Cin, H, W), dtype=jnp.float32)
    fan_in = Cin * KH * KW
    weights = jax.random.normal(
        kw_, (WEIGHTBITS, Cout, Cin, KH, KW), dtype=jnp.float32) / jnp.sqrt(fan_in)
    biases = jax.random.normal(kb, (WEIGHTBITS, Cout), dtype=jnp.float32) * 0.1

    out = conv2d_split2binary(x, weights, biases,
                              stride=stride, padding=padding, dilation=dilation)
    jax.block_until_ready(out)

    ref = _reference(x, weights, biases,
                     stride=stride, padding=padding, dilation=dilation)
    assert out.shape == (N, Cout, H, W), out.shape
    # bf16 matmul operands with f32 accumulation -> relaxed tolerance.
    assert jnp.allclose(out, ref, atol=5e-2, rtol=5e-2), float(
        jnp.max(jnp.abs(out - ref)))

    print("KERNEL_OK")
</pallas_src>

<mosaic_0001>
module attributes {stable_mosaic.version = 11 : i64} {
  func.func @_matmul_bias_single_k_kernel(%arg0: i32, %arg1: i32, %arg2: memref<512x36xbf16, #tpu.memory_space<vmem>>, %arg3: memref<36x128xbf16, #tpu.memory_space<vmem>>, %arg4: memref<1x128xf32, #tpu.memory_space<vmem>>, %arg5: memref<512x128xf32, #tpu.memory_space<vmem>>) attributes {dimension_semantics = [#tpu.dimension_semantics<parallel>, #tpu.dimension_semantics<parallel>], iteration_bounds = array<i64: 1, 1>, scalar_prefetch = 0 : i64, scratch_operands = 0 : i64, tpu.core_type = #tpu.core_type<tc>, window_params = [{transform_indices = @transform_0, window_bounds = array<i64: 512, 36>}, {transform_indices = @transform_1, window_bounds = array<i64: 36, 128>}, {transform_indices = @transform_2, window_bounds = array<i64: 1, 128>}, {transform_indices = @transform_3, window_bounds = array<i64: 512, 128>}]} {
    %c0 = arith.constant 0 : index
    %c0_0 = arith.constant 0 : index
    %0 = vector.load %arg2[%c0, %c0_0] : memref<512x36xbf16, #tpu.memory_space<vmem>>, vector<512x36xbf16>
    %c0_1 = arith.constant 0 : index
    %c0_2 = arith.constant 0 : index
    %1 = vector.load %arg3[%c0_1, %c0_2] : memref<36x128xbf16, #tpu.memory_space<vmem>>, vector<36x128xbf16>
    %cst = arith.constant dense<0.000000e+00> : vector<512x128xf32>
    %2 = tpu.matmul %0, %1, %cst {dimension_numbers = #tpu.dot_dimension_numbers<[1], [0], [0], [1], [0, 0, 1, 1], [], []>} : vector<512x36xbf16>, vector<36x128xbf16>, vector<512x128xf32> -> vector<512x128xf32>
    %c0_3 = arith.constant 0 : index
    %c0_4 = arith.constant 0 : index
    %3 = vector.load %arg4[%c0_3, %c0_4] : memref<1x128xf32, #tpu.memory_space<vmem>>, vector<1x128xf32>
    %4 = vector.broadcast %3 : vector<1x128xf32> to vector<512x128xf32>
    %5 = arith.addf %2, %4 : vector<512x128xf32>
    %c0_5 = arith.constant 0 : index
    %c0_6 = arith.constant 0 : index
    %6 = vector.load %arg5[%c0_5, %c0_6] : memref<512x128xf32, #tpu.memory_space<vmem>>, vector<512x128xf32>
    tpu.vector_store %arg5[%c0_5, %c0_6], %5 {strides = array<i32>} : memref<512x128xf32, #tpu.memory_space<vmem>>, vector<512x128xf32>,
    return
  }
  func.func @transform_0(%arg0: i32, %arg1: i32) -> (i32, i32) {
    %c0_i32 = arith.constant 0 : i32
    %c0_i32_0 = arith.constant 0 : i32
    return %arg0, %c0_i32 : i32, i32
  }
  func.func @transform_1(%arg0: i32, %arg1: i32) -> (i32, i32) {
    %c0_i32 = arith.constant 0 : i32
    %c0_i32_0 = arith.constant 0 : i32
    return %c0_i32, %arg1 : i32, i32
  }
  func.func @transform_2(%arg0: i32, %arg1: i32) -> (i32, i32) {
    %c0_i32 = arith.constant 0 : i32
    %c0_i32_0 = arith.constant 0 : i32
    return %c0_i32, %arg1 : i32, i32
  }
  func.func @transform_3(%arg0: i32, %arg1: i32) -> (i32, i32) {
    %c0_i32 = arith.constant 0 : i32
    return %arg0, %arg1 : i32, i32
  }
}

</mosaic_0001>

<bundles_post_ra>
// kernel: conv2d_split2binary.1
= control target key start
LH: loop header
LB: loop body
LE: loop exit
PB: predicated region body
PF: predicated region fallthrough
CT: control target
= control target key end

     0   :  { %vm266_vm0 = vcmask 293888   ;;  %vm363_vm1 = vcmask 1041408   ;;  %s1358_s1 = inlined_call_operand.vmem [shape: bf16[36,128], index: 1, kind: input, shape index: {}]   ;;  %s1359_s0 = inlined_call_operand.vmem [shape: bf16[512,36], index: 0, kind: input, shape index: {}]   ;;  %s1360_s2 = inlined_call_operand.vmem [shape: f32[1,128], index: 2, kind: input, shape index: {}]   ;;  %s1361_s3 = inlined_call_operand.vmem [shape: f32[512,128], index: 3, kind: output, shape index: {}]  }
   0x1   :  { %v905_v0 = vld [vmem:[%s1358_s1] sm:$0xff]   ;;  %v906_v1 = vld [vmem:[%s1358_s1 + $0x8] sm:$0xff]   ;;  %v907_v2 = vld [vmem:[%s1358_s1 + $0x10] ss:$0 sps:$4 sm:$0x33]  }
   0x2   :  { %827 = vmatprep.subr.bf16.mxu0 %v905_v0  ;;  %897 = vmatprep.subr.bf16.mxu1 %v905_v0  ;;  %v908_v3 = vld [vmem:[%s1359_s0] sm:$0xff]   ;;  %v365_v5 = vsel %vm363_vm1, %v907_v2, 0  ;;  %v910_v6 = vld [vmem:[%s1359_s0 + $0x8] sm:$0xff]   ;;  %v912_v8 = vld [vmem:[%s1359_s0 + $0x10] sm:$0xff]  }
   0x3   :  { %828 = vmatpush3.bf16.msra.mxu0 %v905_v0  ;;  %900 = vmatpush3.bf16.msra.mxu1 %v905_v0  ;;  %v909_v4 = vld [vmem:[%s1359_s0 + $0x80] sm:$0xff]   ;;  %v911_v7 = vld [vmem:[%s1359_s0 + $0x88] sm:$0xff]   ;;  %v913_v9 = vld [vmem:[%s1359_s0 + $0x90] sm:$0xff]  }
   0x4   :  { %829 = vmatprep.subr.bf16.mxu0 %v906_v1  ;;  %898 = vmatprep.subr.bf16.mxu1 %v906_v1  ;;  %v914_v10 = vld [vmem:[%s1359_s0 + $0x18] sm:$0xff]   ;;  %v916_v12 = vld [vmem:[%s1359_s0 + $0x20] sm:$0xff]   ;;  %v918_v14 = vld [vmem:[%s1359_s0 + $0x28] sm:$0xff]  }
   0x5   :  { %833 = vmatprep.mubr.msk.bf16.mxu0 %vm266_vm0, %v908_v3  ;;  %865 = vmatprep.mubr.msk.bf16.mxu1 %vm266_vm0, %v909_v4  ;;  %v915_v11 = vld [vmem:[%s1359_s0 + $0x98] sm:$0xff]   ;;  %v917_v13 = vld [vmem:[%s1359_s0 + $0xa0] sm:$0xff]   ;;  %v919_v15 = vld [vmem:[%s1359_s0 + $0xa8] sm:$0xff]  }
   0x6   :  { %v920_v16 = vld [vmem:[%s1359_s0 + $0x30] sm:$0xff]   ;;  %v922_v18 = vld [vmem:[%s1359_s0 + $0x38] sm:$0xff]   ;;  %v924_v20 = vld [vmem:[%s1359_s0 + $0x40] sm:$0xff]  }
   0x7   :  { %830 = vmatpush3.bf16.msra.mxu0 %v906_v1  ;;  %901 = vmatpush3.bf16.msra.mxu1 %v906_v1  ;;  %v921_v17 = vld [vmem:[%s1359_s0 + $0xb0] sm:$0xff]   ;;  %v923_v19 = vld [vmem:[%s1359_s0 + $0xb8] sm:$0xff]   ;;  %v925_v21 = vld [vmem:[%s1359_s0 + $0xc0] sm:$0xff]  }
   0x8   :  { %903 = vmatprep.subr.msk.bf16.mxu0 %vm363_vm1, %v907_v2  ;;  %904 = vmatprep.subr.msk.bf16.mxu1 %vm363_vm1, %v907_v2  ;;  %v926_v22 = vld [vmem:[%s1359_s0 + $0x48] sm:$0xff]   ;;  %v928_v24 = vld [vmem:[%s1359_s0 + $0x50] sm:$0xff]   ;;  %v930_v26 = vld [vmem:[%s1359_s0 + $0x58] sm:$0xff]  }
   0x9   :  { %v927_v23 = vld [vmem:[%s1359_s0 + $0xc8] sm:$0xff]   ;;  %v929_v25 = vld [vmem:[%s1359_s0 + $0xd0] sm:$0xff]   ;;  %v931_v27 = vld [vmem:[%s1359_s0 + $0xd8] sm:$0xff]  }
   0xa   :  { %v932_v28 = vld [vmem:[%s1359_s0 + $0x60] sm:$0xff]   ;;  %v934_v30 = vld [vmem:[%s1359_s0 + $0x68] sm:$0xff]   ;;  %v936_v32 = vld [vmem:[%s1359_s0 + $0x70] sm:$0xff]  }
   0xb   :  { %832 = vmatpush3.bf16.msra.mxu0 %v365_v5  ;;  %902 = vmatpush3.bf16.msra.mxu1 %v365_v5  ;;  %v933_v29 = vld [vmem:[%s1359_s0 + $0xe0] sm:$0xff]   ;;  %v935_v31 = vld [vmem:[%s1359_s0 + $0xe8] sm:$0xff]   ;;  %v937_v33 = vld [vmem:[%s1359_s0 + $0xf0] sm:$0xff]  }
   0xc   :  { %v938_v34 = vld [vmem:[%s1359_s0 + $0x78] sm:$0xff]   ;;  %v1100_v36 = vld [vmem:[%s1360_s2] ss:$0 sm:$0xff] }
   0xd   :  { %v939_v35 = vld [vmem:[%s1359_s0 + $0xf8] sm:$0xff]  }
   0xe   :  { %834 = vmatmul.mubr.msk.bf16.vlgmr.msra.gmra.mrb[0].mxu0 %vm266_vm0, %v910_v6  ;;  %866 = vmatmul.mubr.msk.bf16.vlgmr.msra.gmra.mrb[0].mxu1 %vm266_vm0, %v911_v7 }
   0xf   :  { %837 = vmatprep.mubr.msk.bf16.mxu0 %vm266_vm0, %v912_v8  ;;  %869 = vmatprep.mubr.msk.bf16.mxu1 %vm266_vm0, %v913_v9 }
  0x16   :  { %838 = vmatmul.mubr.msk.bf16.gmra.mrb[4].mxu0 %vm266_vm0, %v914_v10  ;;  %870 = vmatmul.mubr.msk.bf16.gmra.mrb[4].mxu1 %vm266_vm0, %v915_v11 }
  0x17   :  { %841 = vmatprep.mubr.msk.bf16.mxu0 %vm266_vm0, %v916_v12  ;;  %873 = vmatprep.mubr.msk.bf16.mxu1 %vm266_vm0, %v917_v13 }
  0x1e   :  { %842 = vmatmul.mubr.msk.bf16.gmra.mrb[8].mxu0 %vm266_vm0, %v918_v14  ;;  %874 = vmatmul.mubr.msk.bf16.gmra.mrb[8].mxu1 %vm266_vm0, %v919_v15 }
  0x1f   :  { %845 = vmatprep.mubr.msk.bf16.mxu0 %vm266_vm0, %v920_v16  ;;  %877 = vmatprep.mubr.msk.bf16.mxu1 %vm266_vm0, %v921_v17 }
  0x26   :  { %846 = vmatmul.mubr.msk.bf16.gmra.mrb[12].mxu0 %vm266_vm0, %v922_v18  ;;  %878 = vmatmul.mubr.msk.bf16.gmra.mrb[12].mxu1 %vm266_vm0, %v923_v19 }
  0x27   :  { %849 = vmatprep.mubr.msk.bf16.mxu0 %vm266_vm0, %v924_v20  ;;  %881 = vmatprep.mubr.msk.bf16.mxu1 %vm266_vm0, %v925_v21 }
  0x2e   :  { %850 = vmatmul.mubr.msk.bf16.gmra.mrb[16].mxu0 %vm266_vm0, %v926_v22  ;;  %882 = vmatmul.mubr.msk.bf16.gmra.mrb[16].mxu1 %vm266_vm0, %v927_v23 }
  0x2f   :  { %853 = vmatprep.mubr.msk.bf16.mxu0 %vm266_vm0, %v928_v24  ;;  %885 = vmatprep.mubr.msk.bf16.mxu1 %vm266_vm0, %v929_v25 }
  0x36   :  { %854 = vmatmul.mubr.msk.bf16.gmra.mrb[20].mxu0 %vm266_vm0, %v930_v26  ;;  %886 = vmatmul.mubr.msk.bf16.gmra.mrb[20].mxu1 %vm266_vm0, %v931_v27 }
  0x37   :  { %857 = vmatprep.mubr.msk.bf16.mxu0 %vm266_vm0, %v932_v28  ;;  %889 = vmatprep.mubr.msk.bf16.mxu1 %vm266_vm0, %v933_v29 }
  0x3e   :  { %858 = vmatmul.mubr.msk.bf16.gmra.mrb[24].mxu0 %vm266_vm0, %v934_v30  ;;  %890 = vmatmul.mubr.msk.bf16.gmra.mrb[24].mxu1 %vm266_vm0, %v935_v31 }
  0x3f   :  { %861 = vmatprep.mubr.msk.bf16.mxu0 %vm266_vm0, %v936_v32  ;;  %893 = vmatprep.mubr.msk.bf16.mxu1 %vm266_vm0, %v937_v33 }
  0x46   :  { %862 = vmatmul.mubr.msk.bf16.gmra.mrb[28].mxu0 %vm266_vm0, %v938_v34  ;;  %894 = vmatmul.mubr.msk.bf16.gmra.mrb[28].mxu1 %vm266_vm0, %v939_v35 }
  0xe1   :  { %v835_v37 = vpop.f32.mrb[0].mxu0  ;;  %v867_v38 = vpop.f32.mrb[0].mxu1 }
  0xe2   :  { %v410_v39 = vadd.f32 %v835_v37, %v1100_v36  ;;  %v538_v40 = vadd.f32 %v867_v38, %v1100_v36  ;;  %v401_v41 = vpop.f32.mrb[1].mxu0  ;;  %v529_v42 = vpop.f32.mrb[1].mxu1 }
  0xe3   :  { %v402_v43 = vadd.f32 %v1100_v36, %v401_v41  ;;  %v530_v44 = vadd.f32 %v1100_v36, %v529_v42  ;;  %v836_v45 = vpop.f32.mrb[2].mxu0  ;;  %v868_v46 = vpop.f32.mrb[2].mxu1 }
  0xe4   :  { %658 = vst [vmem:[%s1361_s3 + $0x10] sm:$0xff] %v410_v39  ;;  %690 = vst [vmem:[%s1361_s3 + $0x110] sm:$0xff] %v538_v40  ;;  %v413_v47 = vadd.f32 %v836_v45, %v1100_v36  ;;  %v541_v48 = vadd.f32 %v868_v46, %v1100_v36  ;;  %v404_v49 = vpop.f32.mrb[3].mxu0  ;;  %v532_v50 = vpop.f32.mrb[3].mxu1 }
  0xe5   :  { %656 = vst [vmem:[%s1361_s3] sm:$0xff] %v402_v43  ;;  %688 = vst [vmem:[%s1361_s3 + $0x100] sm:$0xff] %v530_v44  ;;  %v405_v51 = vadd.f32 %v1100_v36, %v404_v49  ;;  %v533_v52 = vadd.f32 %v1100_v36, %v532_v50 }
  0xe6   :  { %659 = vst [vmem:[%s1361_s3 + $0x18] sm:$0xff] %v413_v47  ;;  %691 = vst [vmem:[%s1361_s3 + $0x118] sm:$0xff] %v541_v48 }
  0xe7   :  { %657 = vst [vmem:[%s1361_s3 + $0x8] sm:$0xff] %v405_v51  ;;  %689 = vst [vmem:[%s1361_s3 + $0x108] sm:$0xff] %v533_v52 }
  0xe9   :  { %v839_v53 = vpop.f32.mrb[4].mxu0  ;;  %v871_v54 = vpop.f32.mrb[4].mxu1 }
  0xea   :  { %v426_v55 = vadd.f32 %v839_v53, %v1100_v36  ;;  %v554_v56 = vadd.f32 %v871_v54, %v1100_v36  ;;  %v417_v57 = vpop.f32.mrb[5].mxu0  ;;  %v545_v58 = vpop.f32.mrb[5].mxu1 }
  0xeb   :  { %v418_v59 = vadd.f32 %v1100_v36, %v417_v57  ;;  %v546_v60 = vadd.f32 %v1100_v36, %v545_v58  ;;  %v840_v61 = vpop.f32.mrb[6].mxu0  ;;  %v872_v62 = vpop.f32.mrb[6].mxu1 }
  0xec   :  { %662 = vst [vmem:[%s1361_s3 + $0x30] sm:$0xff] %v426_v55  ;;  %694 = vst [vmem:[%s1361_s3 + $0x130] sm:$0xff] %v554_v56  ;;  %v429_v63 = vadd.f32 %v840_v61, %v1100_v36  ;;  %v557_v0 = vadd.f32 %v872_v62, %v1100_v36  ;;  %v420_v1 = vpop.f32.mrb[7].mxu0  ;;  %v548_v2 = vpop.f32.mrb[7].mxu1 }
  0xed   :  { %660 = vst [vmem:[%s1361_s3 + $0x20] sm:$0xff] %v418_v59  ;;  %692 = vst [vmem:[%s1361_s3 + $0x120] sm:$0xff] %v546_v60  ;;  %v421_v3 = vadd.f32 %v1100_v36, %v420_v1  ;;  %v549_v4 = vadd.f32 %v1100_v36, %v548_v2 }
  0xee   :  { %663 = vst [vmem:[%s1361_s3 + $0x38] sm:$0xff] %v429_v63  ;;  %695 = vst [vmem:[%s1361_s3 + $0x138] sm:$0xff] %v557_v0 }
  0xef   :  { %661 = vst [vmem:[%s1361_s3 + $0x28] sm:$0xff] %v421_v3  ;;  %693 = vst [vmem:[%s1361_s3 + $0x128] sm:$0xff] %v549_v4 }
  0xf1   :  { %v843_v5 = vpop.f32.mrb[8].mxu0  ;;  %v875_v6 = vpop.f32.mrb[8].mxu1 }
  0xf2   :  { %v442_v7 = vadd.f32 %v843_v5, %v1100_v36  ;;  %v570_v8 = vadd.f32 %v875_v6, %v1100_v36  ;;  %v433_v9 = vpop.f32.mrb[9].mxu0  ;;  %v561_v10 = vpop.f32.mrb[9].mxu1 }
  0xf3   :  { %v434_v11 = vadd.f32 %v1100_v36, %v433_v9  ;;  %v562_v12 = vadd.f32 %v1100_v36, %v561_v10  ;;  %v844_v13 = vpop.f32.mrb[10].mxu0  ;;  %v876_v14 = vpop.f32.mrb[10].mxu1 }
  0xf4   :  { %666 = vst [vmem:[%s1361_s3 + $0x50] sm:$0xff] %v442_v7  ;;  %698 = vst [vmem:[%s1361_s3 + $0x150] sm:$0xff] %v570_v8  ;;  %v445_v15 = vadd.f32 %v844_v13, %v1100_v36  ;;  %v573_v16 = vadd.f32 %v876_v14, %v1100_v36  ;;  %v436_v17 = vpop.f32.mrb[11].mxu0  ;;  %v564_v18 = vpop.f32.mrb[11].mxu1 }
  0xf5   :  { %664 = vst [vmem:[%s1361_s3 + $0x40] sm:$0xff] %v434_v11  ;;  %696 = vst [vmem:[%s1361_s3 + $0x140] sm:$0xff] %v562_v12  ;;  %v437_v19 = vadd.f32 %v1100_v36, %v436_v17  ;;  %v565_v20 = vadd.f32 %v1100_v36, %v564_v18 }
  0xf6   :  { %667 = vst [vmem:[%s1361_s3 + $0x58] sm:$0xff] %v445_v15  ;;  %699 = vst [vmem:[%s1361_s3 + $0x158] sm:$0xff] %v573_v16 }
  0xf7   :  { %665 = vst [vmem:[%s1361_s3 + $0x48] sm:$0xff] %v437_v19  ;;  %697 = vst [vmem:[%s1361_s3 + $0x148] sm:$0xff] %v565_v20 }
  0xf9   :  { %v847_v21 = vpop.f32.mrb[12].mxu0  ;;  %v879_v22 = vpop.f32.mrb[12].mxu1 }
  0xfa   :  { %v458_v23 = vadd.f32 %v847_v21, %v1100_v36  ;;  %v586_v24 = vadd.f32 %v879_v22, %v1100_v36  ;;  %v449_v25 = vpop.f32.mrb[13].mxu0  ;;  %v577_v26 = vpop.f32.mrb[13].mxu1 }
  0xfb   :  { %v450_v27 = vadd.f32 %v1100_v36, %v449_v25  ;;  %v578_v28 = vadd.f32 %v1100_v36, %v577_v26  ;;  %v848_v29 = vpop.f32.mrb[14].mxu0  ;;  %v880_v30 = vpop.f32.mrb[14].mxu1 }
  0xfc   :  { %670 = vst [vmem:[%s1361_s3 + $0x70] sm:$0xff] %v458_v23  ;;  %702 = vst [vmem:[%s1361_s3 + $0x170] sm:$0xff] %v586_v24  ;;  %v461_v31 = vadd.f32 %v848_v29, %v1100_v36  ;;  %v589_v32 = vadd.f32 %v880_v30, %v1100_v36  ;;  %v452_v33 = vpop.f32.mrb[15].mxu0  ;;  %v580_v34 = vpop.f32.mrb[15].mxu1 }
  0xfd   :  { %668 = vst [vmem:[%s1361_s3 + $0x60] sm:$0xff] %v450_v27  ;;  %700 = vst [vmem:[%s1361_s3 + $0x160] sm:$0xff] %v578_v28  ;;  %v453_v35 = vadd.f32 %v1100_v36, %v452_v33  ;;  %v581_v37 = vadd.f32 %v1100_v36, %v580_v34 }
  0xfe   :  { %671 = vst [vmem:[%s1361_s3 + $0x78] sm:$0xff] %v461_v31  ;;  %703 = vst [vmem:[%s1361_s3 + $0x178] sm:$0xff] %v589_v32 }
  0xff   :  { %669 = vst [vmem:[%s1361_s3 + $0x68] sm:$0xff] %v453_v35  ;;  %701 = vst [vmem:[%s1361_s3 + $0x168] sm:$0xff] %v581_v37 }
 0x101   :  { %v851_v38 = vpop.f32.mrb[16].mxu0  ;;  %v883_v39 = vpop.f32.mrb[16].mxu1 }
 0x102   :  { %v474_v40 = vadd.f32 %v851_v38, %v1100_v36  ;;  %v602_v41 = vadd.f32 %v883_v39, %v1100_v36  ;;  %v465_v42 = vpop.f32.mrb[17].mxu0  ;;  %v593_v43 = vpop.f32.mrb[17].mxu1 }
 0x103   :  { %v466_v44 = vadd.f32 %v1100_v36, %v465_v42  ;;  %v594_v45 = vadd.f32 %v1100_v36, %v593_v43  ;;  %v852_v46 = vpop.f32.mrb[18].mxu0  ;;  %v884_v47 = vpop.f32.mrb[18].mxu1 }
 0x104   :  { %674 = vst [vmem:[%s1361_s3 + $0x90] sm:$0xff] %v474_v40  ;;  %706 = vst [vmem:[%s1361_s3 + $0x190] sm:$0xff] %v602_v41  ;;  %v477_v48 = vadd.f32 %v852_v46, %v1100_v36  ;;  %v605_v49 = vadd.f32 %v884_v47, %v1100_v36  ;;  %v468_v50 = vpop.f32.mrb[19].mxu0  ;;  %v596_v51 = vpop.f32.mrb[19].mxu1 }
 0x105   :  { %672 = vst [vmem:[%s1361_s3 + $0x80] sm:$0xff] %v466_v44  ;;  %704 = vst [vmem:[%s1361_s3 + $0x180] sm:$0xff] %v594_v45  ;;  %v469_v52 = vadd.f32 %v1100_v36, %v468_v50  ;;  %v597_v53 = vadd.f32 %v1100_v36, %v596_v51 }
 0x106   :  { %675 = vst [vmem:[%s1361_s3 + $0x98] sm:$0xff] %v477_v48  ;;  %707 = vst [vmem:[%s1361_s3 + $0x198] sm:$0xff] %v605_v49 }
 0x107   :  { %673 = vst [vmem:[%s1361_s3 + $0x88] sm:$0xff] %v469_v52  ;;  %705 = vst [vmem:[%s1361_s3 + $0x188] sm:$0xff] %v597_v53 }
 0x109   :  { %v855_v54 = vpop.f32.mrb[20].mxu0  ;;  %v887_v55 = vpop.f32.mrb[20].mxu1 }
 0x10a   :  { %v490_v56 = vadd.f32 %v855_v54, %v1100_v36  ;;  %v618_v57 = vadd.f32 %v887_v55, %v1100_v36  ;;  %v481_v58 = vpop.f32.mrb[21].mxu0  ;;  %v609_v59 = vpop.f32.mrb[21].mxu1 }
 0x10b   :  { %v482_v60 = vadd.f32 %v1100_v36, %v481_v58  ;;  %v610_v61 = vadd.f32 %v1100_v36, %v609_v59  ;;  %v856_v62 = vpop.f32.mrb[22].mxu0  ;;  %v888_v63 = vpop.f32.mrb[22].mxu1 }
 0x10c   :  { %678 = vst [vmem:[%s1361_s3 + $0xb0] sm:$0xff] %v490_v56  ;;  %710 = vst [vmem:[%s1361_s3 + $0x1b0] sm:$0xff] %v618_v57  ;;  %v493_v0 = vadd.f32 %v856_v62, %v1100_v36  ;;  %v621_v1 = vadd.f32 %v888_v63, %v1100_v36  ;;  %v484_v2 = vpop.f32.mrb[23].mxu0  ;;  %v612_v3 = vpop.f32.mrb[23].mxu1 }
 0x10d   :  { %676 = vst [vmem:[%s1361_s3 + $0xa0] sm:$0xff] %v482_v60  ;;  %708 = vst [vmem:[%s1361_s3 + $0x1a0] sm:$0xff] %v610_v61  ;;  %v485_v4 = vadd.f32 %v1100_v36, %v484_v2  ;;  %v613_v5 = vadd.f32 %v1100_v36, %v612_v3 }
 0x10e   :  { %679 = vst [vmem:[%s1361_s3 + $0xb8] sm:$0xff] %v493_v0  ;;  %711 = vst [vmem:[%s1361_s3 + $0x1b8] sm:$0xff] %v621_v1 }
 0x10f   :  { %677 = vst [vmem:[%s1361_s3 + $0xa8] sm:$0xff] %v485_v4  ;;  %709 = vst [vmem:[%s1361_s3 + $0x1a8] sm:$0xff] %v613_v5 }
 0x111   :  { %v859_v6 = vpop.f32.mrb[24].mxu0  ;;  %v891_v7 = vpop.f32.mrb[24].mxu1 }
 0x112   :  { %v506_v8 = vadd.f32 %v859_v6, %v1100_v36  ;;  %v634_v9 = vadd.f32 %v891_v7, %v1100_v36  ;;  %v497_v10 = vpop.f32.mrb[25].mxu0  ;;  %v625_v11 = vpop.f32.mrb[25].mxu1 }
 0x113   :  { %v498_v12 = vadd.f32 %v1100_v36, %v497_v10  ;;  %v626_v13 = vadd.f32 %v1100_v36, %v625_v11  ;;  %v860_v14 = vpop.f32.mrb[26].mxu0  ;;  %v892_v15 = vpop.f32.mrb[26].mxu1 }
 0x114   :  { %682 = vst [vmem:[%s1361_s3 + $0xd0] sm:$0xff] %v506_v8  ;;  %714 = vst [vmem:[%s1361_s3 + $0x1d0] sm:$0xff] %v634_v9  ;;  %v509_v16 = vadd.f32 %v860_v14, %v1100_v36  ;;  %v637_v17 = vadd.f32 %v892_v15, %v1100_v36  ;;  %v500_v18 = vpop.f32.mrb[27].mxu0  ;;  %v628_v19 = vpop.f32.mrb[27].mxu1 }
 0x115   :  { %680 = vst [vmem:[%s1361_s3 + $0xc0] sm:$0xff] %v498_v12  ;;  %712 = vst [vmem:[%s1361_s3 + $0x1c0] sm:$0xff] %v626_v13  ;;  %v501_v20 = vadd.f32 %v1100_v36, %v500_v18  ;;  %v629_v21 = vadd.f32 %v1100_v36, %v628_v19 }
 0x116   :  { %683 = vst [vmem:[%s1361_s3 + $0xd8] sm:$0xff] %v509_v16  ;;  %715 = vst [vmem:[%s1361_s3 + $0x1d8] sm:$0xff] %v637_v17 }
 0x117   :  { %681 = vst [vmem:[%s1361_s3 + $0xc8] sm:$0xff] %v501_v20  ;;  %713 = vst [vmem:[%s1361_s3 + $0x1c8] sm:$0xff] %v629_v21 }
 0x119   :  { %v863_v22 = vpop.f32.mrb[28].mxu0  ;;  %v895_v23 = vpop.f32.mrb[28].mxu1 }
 0x11a   :  { %v522_v24 = vadd.f32 %v863_v22, %v1100_v36  ;;  %v650_v25 = vadd.f32 %v895_v23, %v1100_v36  ;;  %v513_v26 = vpop.f32.mrb[29].mxu0  ;;  %v641_v27 = vpop.f32.mrb[29].mxu1 }
 0x11b   :  { %v514_v28 = vadd.f32 %v1100_v36, %v513_v26  ;;  %v642_v29 = vadd.f32 %v1100_v36, %v641_v27  ;;  %v864_v30 = vpop.f32.mrb[30].mxu0  ;;  %v896_v31 = vpop.f32.mrb[30].mxu1 }
 0x11c   :  { %686 = vst [vmem:[%s1361_s3 + $0xf0] sm:$0xff] %v522_v24  ;;  %718 = vst [vmem:[%s1361_s3 + $0x1f0] sm:$0xff] %v650_v25  ;;  %v525_v32 = vadd.f32 %v864_v30, %v1100_v36  ;;  %v653_v33 = vadd.f32 %v896_v31, %v1100_v36  ;;  %v516_v34 = vpop.f32.mrb[31].mxu0  ;;  %v644_v35 = vpop.f32.mrb[31].mxu1 }
 0x11d   :  { %684 = vst [vmem:[%s1361_s3 + $0xe0] sm:$0xff] %v514_v28  ;;  %716 = vst [vmem:[%s1361_s3 + $0x1e0] sm:$0xff] %v642_v29  ;;  %v517_v37 = vadd.f32 %v1100_v36, %v516_v34  ;;  %v645_v38 = vadd.f32 %v1100_v36, %v644_v35 }
 0x11e   :  { %687 = vst [vmem:[%s1361_s3 + $0xf8] sm:$0xff] %v525_v32  ;;  %719 = vst [vmem:[%s1361_s3 + $0x1f8] sm:$0xff] %v653_v33 }
 0x11f   :  { %685 = vst [vmem:[%s1361_s3 + $0xe8] sm:$0xff] %v517_v37  ;;  %717 = vst [vmem:[%s1361_s3 + $0x1e8] sm:$0xff] %v645_v38 }

</bundles_post_ra>
